<compile_context>
chip_gen: v7x
topology: tpu7x:2x2x1
jax: 0.10.0
libtpu: 0.0.40
codegen_flags: <defaults>
</compile_context>

<pallas_src>
import jax
import jax.numpy as jnp
from jax.experimental import pallas as pl
from jax.experimental.pallas import tpu as pltpu

ALPHA = 1.0
GAMMA = 3.0


def _ce_rows_kernel(logits_ref, targets_ref, ce_ref):
    """Per-row cross entropy: logsumexp(x_row) - x_row[target]."""
    x = logits_ref[...].astype(jnp.float32)      # (TILE_N, C), f32 accumulation
    t = targets_ref[...]                         # (TILE_N, 1) int32
    tn, c = x.shape

    # Numerically stable logsumexp per row.
    row_max = jnp.max(x, axis=-1, keepdims=True)                       # (TILE_N, 1)
    lse = row_max + jnp.log(
        jnp.sum(jnp.exp(x - row_max), axis=-1, keepdims=True))         # (TILE_N, 1)

    # Masked select of the target logit (no float one-hot multiply).
    class_ids = jax.lax.broadcasted_iota(jnp.int32, (tn, c), 1)        # (TILE_N, C)
    picked = jnp.sum(jnp.where(class_ids == t, x, 0.0),
                     axis=-1, keepdims=True)                           # (TILE_N, 1)

    ce_ref[...] = lse - picked


def _choose_tile_n(n, c, itemsize, budget_bytes=10 << 20, max_tile=1024):
    """Largest row tile (multiple of 8) whose working set fits a conservative VMEM budget."""
    # Double-buffered logits input plus ~3 f32-sized (TILE_N, C) temporaries.
    per_row_bytes = c * (2 * itemsize + 3 * 4) + 64
    tile = max(1, budget_bytes // per_row_bytes)
    tile = int(min(tile, max_tile, n))
    if tile < n:
        tile = max(8, (tile // 8) * 8)   # sublane multiple unless one full block
    return tile


def focal_loss(logits, targets, alpha=ALPHA, gamma=GAMMA, tile_n=None):
    """logits: (N, C) float (f32 or bf16); targets: (N,) int class indices. Returns f32 scalar."""
    n, c = logits.shape
    targets_2d = targets.astype(jnp.int32).reshape(n, 1)

    if tile_n is None:
        tile_n = _choose_tile_n(n, c, jnp.dtype(logits.dtype).itemsize)
    tile_n = int(min(tile_n, n))
    grid = (pl.cdiv(n, tile_n),)

    ce_rows = pl.pallas_call(
        _ce_rows_kernel,
        out_shape=jax.ShapeDtypeStruct((n, 1), jnp.float32),
        grid_spec=pltpu.PrefetchScalarGridSpec(
            num_scalar_prefetch=0,
            grid=grid,
            in_specs=[
                pl.BlockSpec((tile_n, c), lambda i: (i, 0)),
                pl.BlockSpec((tile_n, 1), lambda i: (i, 0)),
            ],
            out_specs=pl.BlockSpec((tile_n, 1), lambda i: (i, 0)),
        ),
        compiler_params=pltpu.CompilerParams(
            dimension_semantics=("parallel",)),
    )(logits, targets_2d)

    # Tiny epilogue in plain JAX: mean over rows + focal modulation.
    ce = jnp.mean(ce_rows[:, 0])
    pt = jnp.exp(-ce)
    one_minus_pt = jnp.maximum(1.0 - pt, 0.0)   # guard pow() against tiny negatives
    return (alpha * one_minus_pt ** gamma * ce).astype(jnp.float32)


def _focal_loss_ref(logits, targets, alpha=ALPHA, gamma=GAMMA):
    x = logits.astype(jnp.float32)
    lse = jax.nn.logsumexp(x, axis=-1)
    picked = jnp.take_along_axis(x, targets[:, None].astype(jnp.int32), axis=-1)[:, 0]
    ce = jnp.mean(lse - picked)
    pt = jnp.exp(-ce)
    return alpha * jnp.maximum(1.0 - pt, 0.0) ** gamma * ce


if __name__ == "__main__":
    key = jax.random.PRNGKey(0)
    k1, k2, k3, k4 = jax.random.split(key, 4)

    # Small shape consistent with the module: batch of 8 samples, 32 classes.
    N, C = 8, 32
    logits = jax.random.normal(k1, (N, C), dtype=jnp.float32)
    targets = jax.random.randint(k2, (N,), 0, C, dtype=jnp.int32)

    loss = focal_loss(logits, targets)
    jax.block_until_ready(loss)
    ref = _focal_loss_ref(logits, targets)
    assert jnp.allclose(loss, ref, rtol=1e-5, atol=1e-5), (loss, ref)

    # Second case exercising row tiling (ragged last tile) and a bf16 input.
    N2, C2 = 300, 256
    logits2 = jax.random.normal(k3, (N2, C2), dtype=jnp.float32).astype(jnp.bfloat16)
    targets2 = jax.random.randint(k4, (N2,), 0, C2, dtype=jnp.int32)

    loss2 = focal_loss(logits2, targets2, tile_n=128)
    jax.block_until_ready(loss2)
    ref2 = _focal_loss_ref(logits2, targets2)
    assert jnp.allclose(loss2, ref2, rtol=1e-4, atol=1e-5), (loss2, ref2)

    print("KERNEL_OK")
</pallas_src>

<mosaic_0001>
module attributes {stable_mosaic.version = 11 : i64} {
  func.func @_ce_rows_kernel(%arg0: i32, %arg1: memref<8x32xf32, #tpu.memory_space<vmem>>, %arg2: memref<8x1xi32, #tpu.memory_space<vmem>>, %arg3: memref<8x1xf32, #tpu.memory_space<vmem>>) attributes {dimension_semantics = [#tpu.dimension_semantics<parallel>], iteration_bounds = array<i64: 1>, scalar_prefetch = 0 : i64, scratch_operands = 0 : i64, tpu.core_type = #tpu.core_type<tc>, window_params = [{transform_indices = @transform_0, window_bounds = array<i64: 8, 32>}, {transform_indices = @transform_1, window_bounds = array<i64: 8, 1>}, {transform_indices = @transform_2, window_bounds = array<i64: 8, 1>}]} {
    %c0 = arith.constant 0 : index
    %c0_0 = arith.constant 0 : index
    %0 = vector.load %arg1[%c0, %c0_0] : memref<8x32xf32, #tpu.memory_space<vmem>>, vector<8x32xf32>
    %c0_1 = arith.constant 0 : index
    %c0_2 = arith.constant 0 : index
    %1 = vector.load %arg2[%c0_1, %c0_2] : memref<8x1xi32, #tpu.memory_space<vmem>>, vector<8x1xi32>
    %cst = arith.constant dense<0xFF800000> : vector<8xf32>
    %2 = vector.multi_reduction <maximumf>, %0, %cst [1] : vector<8x32xf32> to vector<8xf32>
    %3 = vector.shape_cast %2 : vector<8xf32> to vector<8x1xf32>
    %4 = vector.broadcast %3 : vector<8x1xf32> to vector<8x32xf32>
    %5 = arith.subf %0, %4 : vector<8x32xf32>
    %6 = math.exp %5 : vector<8x32xf32>
    %cst_3 = arith.constant dense<0.000000e+00> : vector<8xf32>
    %7 = vector.multi_reduction <add>, %6, %cst_3 [1] : vector<8x32xf32> to vector<8xf32>
    %8 = vector.shape_cast %7 : vector<8xf32> to vector<8x1xf32>
    %9 = math.log %8 : vector<8x1xf32>
    %10 = arith.addf %3, %9 : vector<8x1xf32>
    %11 = tpu.iota {dimensions = array<i32: 1>} : vector<8x32xi32>
    %12 = vector.broadcast %1 : vector<8x1xi32> to vector<8x32xi32>
    %13 = arith.cmpi eq, %11, %12 : vector<8x32xi32>
    %cst_4 = arith.constant 0.000000e+00 : f32
    %14 = vector.broadcast %cst_4 : f32 to vector<8x32xf32>
    %15 = arith.select %13, %0, %14 : vector<8x32xi1>, vector<8x32xf32>
    %cst_5 = arith.constant dense<0.000000e+00> : vector<8xf32>
    %16 = vector.multi_reduction <add>, %15, %cst_5 [1] : vector<8x32xf32> to vector<8xf32>
    %17 = vector.shape_cast %16 : vector<8xf32> to vector<8x1xf32>
    %18 = arith.subf %10, %17 : vector<8x1xf32>
    %c0_6 = arith.constant 0 : index
    %c0_7 = arith.constant 0 : index
    %19 = vector.load %arg3[%c0_6, %c0_7] : memref<8x1xf32, #tpu.memory_space<vmem>>, vector<8x1xf32>
    tpu.vector_store %arg3[%c0_6, %c0_7], %18 {strides = array<i32>} : memref<8x1xf32, #tpu.memory_space<vmem>>, vector<8x1xf32>,
    return
  }
  func.func @transform_0(%arg0: i32) -> (i32, i32) {
    %c0_i32 = arith.constant 0 : i32
    %c0_i32_0 = arith.constant 0 : i32
    return %arg0, %c0_i32 : i32, i32
  }
  func.func @transform_1(%arg0: i32) -> (i32, i32) {
    %c0_i32 = arith.constant 0 : i32
    %c0_i32_0 = arith.constant 0 : i32
    return %arg0, %c0_i32 : i32, i32
  }
  func.func @transform_2(%arg0: i32) -> (i32, i32) {
    %c0_i32 = arith.constant 0 : i32
    %c0_i32_0 = arith.constant 0 : i32
    return %arg0, %c0_i32 : i32, i32
  }
}

</mosaic_0001>

<bundles_post_ra>
// kernel: tpu_custom_call.1
= control target key start
LH: loop header
LB: loop body
LE: loop exit
PB: predicated region body
PF: predicated region fallthrough
CT: control target
= control target key end

     0   :  { %vm13_vm0 = vcmask 261120   ;;  %v49_v1 = vmov 0   ;;  %v26_v7 = vlaneseq  ;;  %vm37_vm2 = vcmask 7168   ;;  %s77_s0 = inlined_call_operand.vmem [shape: f32[8,32], index: 0, kind: input, shape index: {}]   ;;  %s78_s1 = inlined_call_operand.vmem [shape: s32[8,1], index: 1, kind: input, shape index: {}]   ;;  %s79_s2 = inlined_call_operand.vmem [shape: f32[8,1], index: 2, kind: output, shape index: {}]  }
   0x1   :  { %v11_v0 = vld [vmem:[%s77_s0] sm:$0xff]  ;;  %44 = vset.pattern.permute.xlu0 %v49_v1 }
   0x2   :  { %v14_v2 = vsel %vm13_vm0, %v11_v0, -inf  ;;  %v12_v3 = vld [vmem:[%s78_s1] sm:$0xff]  ;;  %v27_v8 = vand.u32 127, %v26_v7 }
   0x3   :  { %15 = vmax.xlane.f32.xlu0 %v14_v2 }
  0x19   :  { %29 = vperm.xlu0 %44, %v12_v3  }
  0x90   :  { %v16_v4 = vpop.xlane.xlu0 %15 }
  0x91   :  { %v17_v5 = vsub.f32 %v11_v0, %v16_v4 }
  0x93   :  { %v18_v6 = vmul.f32 1.442695, %v17_v5 }
  0x95   :  { %45 = vpow2.f32 %v18_v6 }
  0x98   :  { %v30_v9 = vpop.permute.xlu0 %29 }
  0x99   :  { %vm31_vm1 = vcmp.eq.s32.totalorder %v27_v8, %v30_v9 }
  0x9a   :  { %v32_v11 = vsel %vm31_vm1, %v11_v0, 0.0 }
  0x9b   :  { %v33_v13 = vsel %vm13_vm0, %v32_v11, 0.0 }
  0x9f   :  { %v46_v10 = vpop.eup %45 }
  0xa0   :  { %v20_v12 = vsel %vm13_vm0, %v46_v10, 0.0 }
  0xa1   :  { %21 = vadd.xlane.f32.xlu1 %v20_v12 }
  0xa5   :  { %34 = vadd.xlane.f32.xlu1 %v33_v13 }
 0x12e   :  { %v22_v14 = vpop.xlane.xlu1 %21 }
 0x12f   :  { %47 = vlog2.f32 %v22_v14 }
 0x132   :  { %v35_v17 = vpop.xlane.xlu1 %34 }
 0x139   :  { %v48_v15 = vpop.eup %47 }
 0x13a   :  { %v24_v16 = vmul.f32 0.6931472, %v48_v15 }
 0x13c   :  { %v25_v18 = vadd.f32 %v24_v16, %v16_v4 }
 0x13e   :  { %v36_v19 = vsub.f32 %v25_v18, %v35_v17 }
 0x140   :  { %38 = vst.msk [vmem:[%s79_s2] sm:$0xff] %vm37_vm2, %v36_v19 }

</bundles_post_ra>
